<compile_context>
chip_gen: v7x
topology: tpu7x:2x2x1
jax: 0.10.0
libtpu: 0.0.40
codegen_flags: <defaults>
</compile_context>

<pallas_src>
import jax
import jax.numpy as jnp
import numpy as np
from jax.experimental import pallas as pl
from jax.experimental.pallas import tpu as pltpu

EPS = 1e-5


# --------------------------------------------------------------------------- #
# Pallas kernel: one grid step per (channel tile, batch tile).
# --------------------------------------------------------------------------- #
def _dlinear_hyper_kernel(x_ref, w_ref, b_ref, cs_ref, out_ref):
    x = x_ref[...]                                        # (tc, tb, L) f32

    # ---- RevIN statistics, one pass over the time axis (biased variance) ----
    inv_l = 1.0 / x.shape[-1]
    mean = jnp.sum(x, axis=-1, keepdims=True) * inv_l     # (tc, tb, 1)
    ex2 = jnp.sum(x * x, axis=-1, keepdims=True) * inv_l  # (tc, tb, 1)
    var = jnp.maximum(ex2 - mean * mean, 0.0)
    stdev = jnp.sqrt(var + EPS)

    # ---- folded per-channel linear head on the MXU (raw x, de-norm folded) ----
    # z[c,b,:] = x[c,b,:] @ W_fold[c]   (weights may be bf16; f32 accumulate)
    z = jnp.einsum(
        "cbl,cld->cbd", x, w_ref[...],
        preferred_element_type=jnp.float32,
    )                                                      # (tc, tb, D) f32

    # out = (x - mean) @ W * (rstd*stdev==1) + b_fold*stdev + mean
    #     = z + stdev*b_fold + mean*(1 - colsum(W_fold))
    out_ref[...] = (z + stdev * b_ref[...] + mean * cs_ref[...]).astype(out_ref.dtype)


# --------------------------------------------------------------------------- #
# Tiling / VMEM budgeting helpers.
# --------------------------------------------------------------------------- #
def _divisors(n):
    ds, i = set(), 1
    while i * i <= n:
        if n % i == 0:
            ds.add(i)
            ds.add(n // i)
        i += 1
    return sorted(ds)


def _vmem_budget_bytes():
    """~80% of this generation's per-core VMEM (v7x-safe 64 MiB fallback)."""
    cap = None
    try:
        cap = int(pltpu.get_tpu_info().vmem_capacity_bytes)
    except Exception:
        cap = None
    if not cap or cap <= 0:
        cap = 64 * 1024 * 1024
    return int(cap * 0.80)


def _pick_tiles(B, C, L, D, w_bytes, budget_bytes):
    """Pick (channel_tile, batch_tile) so ALL double-buffered blocks fit the budget."""
    headroom = 2 * 1024 * 1024                      # Mosaic internal scratch
    budget = max(budget_bytes - headroom, 1 << 20)

    def step_bytes(tc, tb):
        x_b = tc * tb * L * 4                       # input block (always f32)
        w_b = tc * L * D * w_bytes                  # streamed weight block
        o_b = tc * tb * D * 4                       # output block
        s_b = 2 * tc * D * 4                        # bias + colsum blocks
        return 2 * (x_b + w_b + o_b + s_b)          # x2: double buffering

    # batch tile must be the full B or a multiple of 8 (sublane constraint)
    tb_cands = [d for d in _divisors(B) if d == B or d % 8 == 0]
    tc_cands = _divisors(C)

    best = None
    for tc in tc_cands:
        for tb in tb_cands:
            if step_bytes(tc, tb) > budget:
                continue
            score = (tc * tb, tb)                   # amortize per-step overhead
            if best is None or score > best[0]:
                best = (score, tc, tb)
    if best is None:                                # nothing fits: best effort
        tc, tb = 1, min(tb_cands)
    else:
        _, tc, tb = best

    # Ensure >= 2 parallel grid steps so both v7x TensorCores get work.
    if (C // tc) * (B // tb) < 2 and C > 1:
        proper = [d for d in tc_cands if d <= C // 2]
        if proper:
            tc = max(proper)
    return tc, tb


# --------------------------------------------------------------------------- #
# Wrapper.
# --------------------------------------------------------------------------- #
def dlinear_hyper_pallas(x, w_fold, b_fold, *, matmul_dtype=jnp.bfloat16,
                         channel_major_io=False, pad_lanes=None,
                         channel_tile=None, batch_tile=None):
    """Forward pass of DLinearHyper with folded parameters.

    x: (B, C, L) f32  (or (C, B, L) if channel_major_io=True — no transposes).
    w_fold: (C, L, D), b_fold: (C, 1, D).
    Returns (B, C, D)  (or (C, B, D) if channel_major_io=True).
    """
    if channel_major_io:
        C, B, L = x.shape
        xt = x                                       # already channel-major
    else:
        B, C, L = x.shape
        xt = jnp.transpose(x, (1, 0, 2))             # (C, B, L)
    D = w_fold.shape[-1]

    # Host-side pieces of the de-norm fold.
    cs_fold = 1.0 - jnp.sum(w_fold, axis=1, keepdims=True)   # (C, 1, D) f32
    w = w_fold.astype(matmul_dtype)                           # bf16 stream by default
    bf = b_fold

    # Lane-dense output: pad D up to a 128 multiple (only when cheap, or forced).
    if pad_lanes is None:
        pad_lanes = (D % 128 != 0) and (D >= 96)
    Dp = D
    if pad_lanes and D % 128 != 0:
        Dp = ((D + 127) // 128) * 128
        pad = [(0, 0), (0, 0), (0, Dp - D)]
        w = jnp.pad(w, pad)
        bf = jnp.pad(bf, pad)
        cs_fold = jnp.pad(cs_fold, pad)

    w_bytes = np.dtype(matmul_dtype).itemsize
    budget = _vmem_budget_bytes()
    tc, tb = _pick_tiles(B, C, L, Dp, w_bytes, budget)
    if channel_tile is not None:
        tc = channel_tile
    if batch_tile is not None:
        tb = batch_tile
    assert C % tc == 0 and B % tb == 0, "tiles must divide (C, B)"
    nc, nb = C // tc, B // tb

    out_cbd = pl.pallas_call(
        _dlinear_hyper_kernel,
        out_shape=jax.ShapeDtypeStruct((C, B, Dp), jnp.float32),
        grid=(nc, nb),                               # batch innermost: weight block
        in_specs=[                                   # index unchanged -> no re-DMA
            pl.BlockSpec((tc, tb, L), lambda c, b: (c, b, 0)),   # input
            pl.BlockSpec((tc, L, Dp), lambda c, b: (c, 0, 0)),   # folded weights
            pl.BlockSpec((tc, 1, Dp), lambda c, b: (c, 0, 0)),   # folded bias
            pl.BlockSpec((tc, 1, Dp), lambda c, b: (c, 0, 0)),   # 1 - colsum(W)
        ],
        out_specs=pl.BlockSpec((tc, tb, Dp), lambda c, b: (c, b, 0)),
        compiler_params=pltpu.CompilerParams(
            dimension_semantics=("parallel", "parallel"),
            vmem_limit_bytes=int(budget),
        ),
    )(xt, w, bf, cs_fold)

    out = out_cbd[..., :D] if Dp != D else out_cbd
    if channel_major_io:
        return out                                   # (C, B, D), zero transposes
    return jnp.transpose(out, (1, 0, 2))             # (B, C, D)


# --------------------------------------------------------------------------- #
# Plain-JAX glue: parameter init, hypernetwork, host-side algebraic folds.
# --------------------------------------------------------------------------- #
def make_moving_avg_matrix(L, kernel_size):
    """M such that (x @ M)[t] = mean_j x[clip(t + j - half, 0, L-1)] (replicate pad)."""
    half = (kernel_size - 1) // 2
    t = np.arange(L)[None, :]
    j = np.arange(kernel_size)[:, None]
    pos = np.clip(t + j - half, 0, L - 1)
    M = np.zeros((L, L), dtype=np.float32)
    np.add.at(M, (pos, np.broadcast_to(t, pos.shape)), 1.0 / kernel_size)
    return jnp.asarray(M)


def init_params(key, d_input, d_output, d_hyper_hidden, n_input, d_embedding):
    k1, k2, k3, k4, k5 = jax.random.split(key, 5)
    emb = jax.random.normal(k1, (2 * n_input, d_embedding), jnp.float32) * 0.1
    W1 = jax.random.normal(k2, (d_embedding, d_hyper_hidden), jnp.float32) / np.sqrt(d_embedding)
    b1 = jax.random.normal(k3, (d_hyper_hidden,), jnp.float32) * 0.01
    W2 = jax.random.normal(k4, (d_hyper_hidden, d_input * d_output + d_output),
                           jnp.float32) / np.sqrt(d_hyper_hidden)
    b2 = jax.random.normal(k5, (d_input * d_output + d_output,), jnp.float32) * 0.01
    aff_w = jnp.ones((n_input, 1), jnp.float32)     # RevIN affine
    aff_b = jnp.zeros((n_input, 1), jnp.float32)
    return dict(emb=emb, W1=W1, b1=b1, W2=W2, b2=b2, aff_w=aff_w, aff_b=aff_b)


def generate_hyper_weights(params, d_input, d_output, n_input):
    """Hypernetwork: per-channel Linear(d_input, d_output) weights from embeddings."""
    h = jax.nn.relu(params["emb"] @ params["W1"] + params["b1"])          # (2C, H)
    flat = h @ params["W2"] + params["b2"]                                # (2C, L*D + D)
    W = flat[:, : d_input * d_output].reshape(2 * n_input, d_input, d_output)
    bias = flat[:, d_input * d_output:]                                   # (2C, D)
    w_season, w_trend = W[:n_input], W[n_input:]
    b_sum = bias[:n_input] + bias[n_input:]                               # (C, D)
    return w_season, w_trend, b_sum


def fold_parameters(w_season, w_trend, b_sum, ma_mat, aff_w, aff_b):
    """Fold STL decomposition + RevIN affine into one per-channel weight/bias.

      season @ Ws + trend @ Wt = xa @ (Ws + M @ (Wt - Ws)) = xa @ W_eff
      xa = xn * aw + ab,  denorm divides by (aw + EPS^2)
      => xn @ W_fold + b_fold  with  W_fold = W_eff*aw/(aw+EPS^2).
    """
    w_eff = w_season + jnp.einsum("lt,ctd->cld", ma_mat, w_trend - w_season)  # (C, L, D)
    denom = aff_w + EPS * EPS                                                 # (C, 1)
    w_fold = w_eff * (aff_w / denom)[:, :, None]                              # (C, L, D)
    colsum = jnp.sum(w_eff, axis=1)                                           # (C, D)
    b_fold = (aff_b * colsum + b_sum - aff_b) / denom                         # (C, D)
    return w_fold, b_fold[:, None, :]                                         # bias (C, 1, D)


# --------------------------------------------------------------------------- #
# Pure-JAX reference (original, un-folded math) for verification.
# --------------------------------------------------------------------------- #
def reference_forward(x, ma_mat, w_season, w_trend, b_sum, aff_w, aff_b):
    mean = jnp.mean(x, axis=2, keepdims=True)
    var = jnp.mean((x - mean) ** 2, axis=2, keepdims=True)
    stdev = jnp.sqrt(var + EPS)
    xn = (x - mean) / stdev * aff_w[None] + aff_b[None]                   # (B, C, L)
    trend = jnp.einsum("bcl,lt->bct", xn, ma_mat)
    season = xn - trend
    z = (jnp.einsum("bcl,cld->bcd", season, w_season)
         + jnp.einsum("bcl,cld->bcd", trend, w_trend)
         + b_sum[None])
    z = (z - aff_b[None]) / (aff_w[None] + EPS * EPS)
    return z * stdev + mean


if __name__ == "__main__":
    # Small shapes consistent with the module's forward.
    B, n_input, d_input, d_output = 2, 4, 16, 8
    d_hyper_hidden, d_embedding, kernel_size = 32, 8, 7

    key = jax.random.PRNGKey(0)
    kx, kp, ka, kb = jax.random.split(key, 4)
    X = jax.random.normal(kx, (B, n_input, d_input), jnp.float32)

    params = init_params(kp, d_input, d_output, d_hyper_hidden, n_input, d_embedding)
    # Perturb the RevIN affine parameters (a valid trained state) so the
    # host-side affine fold is actually exercised by the correctness check.
    params["aff_w"] = params["aff_w"] + 0.1 * jax.random.normal(ka, (n_input, 1), jnp.float32)
    params["aff_b"] = 0.05 * jax.random.normal(kb, (n_input, 1), jnp.float32)

    w_season, w_trend, b_sum = generate_hyper_weights(params, d_input, d_output, n_input)
    ma_mat = make_moving_avg_matrix(d_input, kernel_size)
    w_fold, b_fold = fold_parameters(w_season, w_trend, b_sum, ma_mat,
                                     params["aff_w"], params["aff_b"])

    ref = reference_forward(X, ma_mat, w_season, w_trend, b_sum,
                            params["aff_w"], params["aff_b"])

    # 1) f32 weight stream: tight tolerance against the un-folded reference.
    out_f32 = jax.block_until_ready(
        dlinear_hyper_pallas(X, w_fold, b_fold, matmul_dtype=jnp.float32))
    assert out_f32.shape == (B, n_input, d_output)
    np.testing.assert_allclose(np.asarray(out_f32), np.asarray(ref), rtol=1e-4, atol=1e-4)

    # 2) Default path: bf16 weight stream, f32 x and f32 accumulation.
    out_def = jax.block_until_ready(dlinear_hyper_pallas(X, w_fold, b_fold))
    np.testing.assert_allclose(np.asarray(out_def), np.asarray(ref), rtol=5e-2, atol=5e-2)

    # 3) Channel-major I/O (no wrapper transposes) + forced lane-dense padded output.
    X_cm = jnp.transpose(X, (1, 0, 2))
    out_cm = jax.block_until_ready(
        dlinear_hyper_pallas(X_cm, w_fold, b_fold, matmul_dtype=jnp.float32,
                             channel_major_io=True, pad_lanes=True))
    np.testing.assert_allclose(np.asarray(jnp.transpose(out_cm, (1, 0, 2))),
                               np.asarray(ref), rtol=1e-4, atol=1e-4)

    print("KERNEL_OK")
</pallas_src>

<mosaic_0001>
module attributes {stable_mosaic.version = 11 : i64} {
  func.func @_dlinear_hyper_kernel(%arg0: i32, %arg1: i32, %arg2: memref<2x2x16xf32, #tpu.memory_space<vmem>>, %arg3: memref<2x16x8xf32, #tpu.memory_space<vmem>>, %arg4: memref<2x1x8xf32, #tpu.memory_space<vmem>>, %arg5: memref<2x1x8xf32, #tpu.memory_space<vmem>>, %arg6: memref<2x2x8xf32, #tpu.memory_space<vmem>>) attributes {dimension_semantics = [#tpu.dimension_semantics<parallel>, #tpu.dimension_semantics<parallel>], iteration_bounds = array<i64: 2, 1>, scalar_prefetch = 0 : i64, scratch_operands = 0 : i64, tpu.core_type = #tpu.core_type<tc>, window_params = [{transform_indices = @transform_0, window_bounds = array<i64: 2, 2, 16>}, {transform_indices = @transform_1, window_bounds = array<i64: 2, 16, 8>}, {transform_indices = @transform_2, window_bounds = array<i64: 2, 1, 8>}, {transform_indices = @transform_3, window_bounds = array<i64: 2, 1, 8>}, {transform_indices = @transform_4, window_bounds = array<i64: 2, 2, 8>}]} {
    %c0 = arith.constant 0 : index
    %c0_0 = arith.constant 0 : index
    %c0_1 = arith.constant 0 : index
    %0 = vector.load %arg2[%c0, %c0_0, %c0_1] : memref<2x2x16xf32, #tpu.memory_space<vmem>>, vector<2x2x16xf32>
    %cst = arith.constant dense<0.000000e+00> : vector<2x2xf32>
    %1 = vector.multi_reduction <add>, %0, %cst [2] : vector<2x2x16xf32> to vector<2x2xf32>
    %2 = vector.shape_cast %1 : vector<2x2xf32> to vector<2x2x1xf32>
    %cst_2 = arith.constant 6.250000e-02 : f32
    %3 = vector.broadcast %cst_2 : f32 to vector<2x2x1xf32>
    %4 = arith.mulf %2, %3 : vector<2x2x1xf32>
    %5 = arith.mulf %0, %0 : vector<2x2x16xf32>
    %cst_3 = arith.constant dense<0.000000e+00> : vector<2x2xf32>
    %6 = vector.multi_reduction <add>, %5, %cst_3 [2] : vector<2x2x16xf32> to vector<2x2xf32>
    %7 = vector.shape_cast %6 : vector<2x2xf32> to vector<2x2x1xf32>
    %cst_4 = arith.constant 6.250000e-02 : f32
    %8 = vector.broadcast %cst_4 : f32 to vector<2x2x1xf32>
    %9 = arith.mulf %7, %8 : vector<2x2x1xf32>
    %10 = arith.mulf %4, %4 : vector<2x2x1xf32>
    %11 = arith.subf %9, %10 : vector<2x2x1xf32>
    %cst_5 = arith.constant 0.000000e+00 : f32
    %12 = vector.broadcast %cst_5 : f32 to vector<2x2x1xf32>
    %13 = arith.maximumf %11, %12 : vector<2x2x1xf32>
    %cst_6 = arith.constant 9.99999974E-6 : f32
    %14 = vector.broadcast %cst_6 : f32 to vector<2x2x1xf32>
    %15 = arith.addf %13, %14 : vector<2x2x1xf32>
    %16 = math.sqrt %15 : vector<2x2x1xf32>
    %c0_7 = arith.constant 0 : index
    %c0_8 = arith.constant 0 : index
    %c0_9 = arith.constant 0 : index
    %17 = vector.load %arg3[%c0_7, %c0_8, %c0_9] : memref<2x16x8xf32, #tpu.memory_space<vmem>>, vector<2x16x8xf32>
    "tpu.trace_start"() <{level = 10 : i32, message = "cbl,cld->cbd"}> : () -> ()
    %cst_10 = arith.constant dense<0.000000e+00> : vector<2x2x8xf32>
    %18 = tpu.matmul %0, %17, %cst_10 {dimension_numbers = #tpu.dot_dimension_numbers<[2], [1], [1], [2], [0, 0, 0, 1, 1, 2], [0], [0]>} : vector<2x2x16xf32>, vector<2x16x8xf32>, vector<2x2x8xf32> -> vector<2x2x8xf32>
    "tpu.trace_stop"() : () -> ()
    %c0_11 = arith.constant 0 : index
    %c0_12 = arith.constant 0 : index
    %c0_13 = arith.constant 0 : index
    %19 = vector.load %arg4[%c0_11, %c0_12, %c0_13] : memref<2x1x8xf32, #tpu.memory_space<vmem>>, vector<2x1x8xf32>
    %20 = vector.broadcast %16 : vector<2x2x1xf32> to vector<2x2x8xf32>
    %21 = vector.broadcast %19 : vector<2x1x8xf32> to vector<2x2x8xf32>
    %22 = arith.mulf %20, %21 : vector<2x2x8xf32>
    %23 = arith.addf %18, %22 : vector<2x2x8xf32>
    %c0_14 = arith.constant 0 : index
    %c0_15 = arith.constant 0 : index
    %c0_16 = arith.constant 0 : index
    %24 = vector.load %arg5[%c0_14, %c0_15, %c0_16] : memref<2x1x8xf32, #tpu.memory_space<vmem>>, vector<2x1x8xf32>
    %25 = vector.broadcast %4 : vector<2x2x1xf32> to vector<2x2x8xf32>
    %26 = vector.broadcast %24 : vector<2x1x8xf32> to vector<2x2x8xf32>
    %27 = arith.mulf %25, %26 : vector<2x2x8xf32>
    %28 = arith.addf %23, %27 : vector<2x2x8xf32>
    %c0_17 = arith.constant 0 : index
    %c0_18 = arith.constant 0 : index
    %c0_19 = arith.constant 0 : index
    %29 = vector.load %arg6[%c0_17, %c0_18, %c0_19] : memref<2x2x8xf32, #tpu.memory_space<vmem>>, vector<2x2x8xf32>
    tpu.vector_store %arg6[%c0_17, %c0_18, %c0_19], %28 {strides = array<i32>} : memref<2x2x8xf32, #tpu.memory_space<vmem>>, vector<2x2x8xf32>,
    return
  }
  func.func @transform_0(%arg0: i32, %arg1: i32) -> (i32, i32, i32) {
    %c0_i32 = arith.constant 0 : i32
    %c0_i32_0 = arith.constant 0 : i32
    return %arg0, %arg1, %c0_i32 : i32, i32, i32
  }
  func.func @transform_1(%arg0: i32, %arg1: i32) -> (i32, i32, i32) {
    %c0_i32 = arith.constant 0 : i32
    %c0_i32_0 = arith.constant 0 : i32
    %c0_i32_1 = arith.constant 0 : i32
    return %arg0, %c0_i32, %c0_i32_0 : i32, i32, i32
  }
  func.func @transform_2(%arg0: i32, %arg1: i32) -> (i32, i32, i32) {
    %c0_i32 = arith.constant 0 : i32
    %c0_i32_0 = arith.constant 0 : i32
    %c0_i32_1 = arith.constant 0 : i32
    return %arg0, %c0_i32, %c0_i32_0 : i32, i32, i32
  }
  func.func @transform_3(%arg0: i32, %arg1: i32) -> (i32, i32, i32) {
    %c0_i32 = arith.constant 0 : i32
    %c0_i32_0 = arith.constant 0 : i32
    %c0_i32_1 = arith.constant 0 : i32
    return %arg0, %c0_i32, %c0_i32_0 : i32, i32, i32
  }
  func.func @transform_4(%arg0: i32, %arg1: i32) -> (i32, i32, i32) {
    %c0_i32 = arith.constant 0 : i32
    %c0_i32_0 = arith.constant 0 : i32
    return %arg0, %arg1, %c0_i32 : i32, i32, i32
  }
}

</mosaic_0001>

<bundles_post_ra>
// kernel: tpu_custom_call.1
= control target key start
LH: loop header
LB: loop body
LE: loop exit
PB: predicated region body
PF: predicated region fallthrough
CT: control target
= control target key end

     0   :  { %9 = vsyncpa [#allocation3], 0  ;;  %s1002_s0 = inlined_call_operand.vmem [shape: f32[4,2,16], index: 0, kind: input, shape index: {}]   ;;  %s1003_s1 = inlined_call_operand.vmem [shape: f32[4,16,8], index: 1, kind: input, shape index: {}]   ;;  %s1004_s2 = inlined_call_operand.vmem [shape: f32[4,1,8], index: 2, kind: input, shape index: {}]   ;;  %s1005_s3 = inlined_call_operand.vmem [shape: f32[4,1,8], index: 3, kind: input, shape index: {}]   ;;  %s1006_s4 = inlined_call_operand.hbm [shape: f32[4,2,8], index: 4, kind: output, shape index: {}]  }
   0x1   :  { %11 = vsyncpa [#allocation3 + $0x1], 0  ;;  %s865_s15 = smov 0   ;;  %s867_s16 = smov 0  }
   0x2   :  { %s869_s17 = smov 0   ;;  %s871_s18 = smov 0  }
   0x3   :  { %s873_s19 = smov 0   ;;  %s875_s20 = smov 0  }
   0x4 LB: > { %s638_s21 = sadd.s32 4294967295, %s832_s20   ;;  %s639_s22 = sadd.s32 4294967294, %s832_s20   ;;  %s832_s20 = sphi %s875_s20, %s17_s20   ;;  %s828_s19 = sphi %s873_s19, %s1013_s19   ;;  %s824_s18 = sphi %s871_s18, %s1012_s18   ;;  %s820_s17 = sphi %s869_s17, %s1011_s17   ;;  %s816_s16 = sphi %s867_s16, %s1010_s16   ;;  %s812_s15 = sphi %s865_s15, %s1009_s15  }
   0x5   : > { %s29_s23 = sadd.s32 1, %s828_s19  ;;  %s144_s24 = sadd.s32 1, %s820_s17 }
   0x6   : > { %p31_p0 = scmp.ge.s32.totalorder %s29_s23, 2  ;;  %p154_p1 = scmp.ne.s32.totalorder %s820_s17, %s816_s16 }
   0x7   : > { %p155_p2 = scmp.eq.s32.totalorder %s638_s21, 1  ;;  %p160_p3 = scmp.ne.s32.totalorder %s816_s16, %s812_s15 }
   0x8   : > { %s1015_s23 = smov (%p31_p0, %s29_s23), 0  ;;  %p161_p5 = scmp.eq.s32.totalorder %s639_s22, 1 }
   0x9   : > { %p905_p4 = por %p155_p2, %p154_p1  ;;  %s139_s26 = ssub.s32 %s828_s19, %s1015_s23 }
   0xa   : > { %p642_p6 = scmp.ge.s32.totalorder %s832_s20, 1  ;;  %p142_p7 = scmp.eq.s32.totalorder %s139_s26, 0 }
   0xb   : > { %p912_p8 = por %p161_p5, %p160_p3  ;;  %p217_p9 = scmp.lt.s32.totalorder %s832_s20, 3 }
   0xc   : > { %s918_s28 = scalar_select %p142_p7, %s820_s17, %s144_s24  }
   0xd   : > { %p218_p10 = pnand %p642_p6, %p217_p9 }
   0xe   : > { %s644_s29 = sshll.u32 (!%p218_p10), %s824_s18, 1  ;;  %v834_v0 = vmov (!%p218_p10), 0.0|0.0   ;;  %vm835_vm0 = vmmov (!%p218_p10), 0   ;;  %v836_v1 = vmov (!%p218_p10), 0.0   ;;  %vm289_vm1 = vcmask (!%p218_p10), 123904   ;;  %s257_s12 = sand.u32 (!%p218_p10), 1, %s816_s16  }
   0xf   : > { %221 = sbr.rel (%p218_p10) target bundleno = 263 (0x107), region = 36  ;;  %684 = vmatprep.subr.bf16.mxu0 (!%p218_p10), %v834_v0  ;;  %687 = vmatprep.subr.bf16.mxu1 (!%p218_p10), %v834_v0  ;;  %p261_p11 = scmp.lt.s32.totalorder (!%p218_p10), %s644_s29, 3  ;;  %vm350_vm2 = vcmask (!%p218_p10), 130048   ;;  %vm515_vm7 = vcmask (!%p218_p10), 58368  }
  0x10   : > { %674 = vmatprep.mubr.msk.f32.mxu0 (!%p218_p10), %vm835_vm0, %v836_v1  ;;  %681 = vmatprep.mubr.msk.f32.mxu1 (!%p218_p10), %vm835_vm0, %v836_v1  ;;  %s643_s22 = sshll.u32 (!%p218_p10), %s257_s12, 2  ;;  %s663_s7 = sshll.u32 (!%p218_p10), %s824_s18, 6 }
  0x11   : > { %s950_s9 = scalar_lea.hbm (!%p218_p10), %s1006_s4, %s663_s7  ;;  %s956_s18 = scalar_lea.sflag (!%p218_p10), [#allocation3], %s257_s12 }
  0x16   : > { %s1017_s29 = smov (!%p261_p11, %s644_s29), 3 }
  0x17   : > { %s662_s30 = sshll.u32 %s1017_s29, 4  ;;  %s645_s5 = sshll.u32 %s1017_s29, 1 }
  0x18   : > { %s274_s8 = scalar_lea.vmem %s1003_s1, %s662_s30  ;;  %s267_s11 = scalar_lea.vmem %s1002_s0, %s645_s5 }
  0x19   : > { %v330_v2 = vld [vmem:[%s274_s8] sm:$0xff]  ;;  %v331_v3 = vld [vmem:[%s274_s8 + $0x8] sm:$0xff]  ;;  %v332_v4 = vld [vmem:[%s274_s8 + $0x10] sm:$0xff]  ;;  %s279_s21 = scalar_lea.vmem %s1004_s2, %s1017_s29  ;;  %s284_s30 = scalar_lea.vmem %s1005_s3, %s1017_s29 }
  0x1a   : > { %v685_v5 = vpack.c.bf16 %v331_v3, %v330_v2  ;;  %v333_v6 = vld [vmem:[%s274_s8 + $0x18] sm:$0xff]  ;;  %v287_v7 = vld [vmem:[%s267_s11] sm:$0x3]  ;;  %v288_v9 = vld [vmem:[%s267_s11 + $0x2] sm:$0x3]  ;;  %s259_s5 = scalar_lea.vmem [#allocation2], %s643_s22 }
  0x1b   : > { %v688_v8 = vpack.c.bf16 %v333_v6, %v332_v4  ;;  %v290_v10 = vsel %vm289_vm1, %v287_v7, 0.0  ;;  %v298_v11 = vmul.f32 %v287_v7, %v287_v7  ;;  %v299_v12 = vmul.f32 %v288_v9, %v288_v9  ;;  %v651_v41 = vld [vmem:[%s279_s21] ss:$0 sm:$0xff]  ;;  %v652_v43 = vld [vmem:[%s279_s21 + $0x1] ss:$0 sm:$0xff]  ;;  %s533_s6 = sshll.u32 %s259_s5, 4  ;;  %s952_s6 = int_to_ptr.vmem [resolvable:$true] %s533_s6 }
  0x1c   : > { %686 = vmatpush3.bf16.msra.mxu0 %v685_v5  ;;  %291 = vadd.xlane.f32.xlu0 %v290_v10  ;;  %v293_v14 = vsel %vm289_vm1, %v288_v9, 0.0  ;;  %v655_v44 = vld [vmem:[%s284_s30] ss:$0 sm:$0xff]  ;;  %v656_v45 = vld [vmem:[%s284_s30 + $0x1] ss:$0 sm:$0xff]  ;;  %s754_s10 = scalar_lea.vmem %s952_s6, 64 }
  0x1d   : > { %689 = vmatpush3.bf16.msra.mxu1 %v688_v8  ;;  %v300_v13 = vsel %vm289_vm1, %v298_v11, 0.0  ;;  %v303_v15 = vsel %vm289_vm1, %v299_v12, 0.0  ;;  %p755_p12 = scmp.ne.s32.totalorder %s952_s6, %s754_s10  ;;  %s837_s11 = smov [#allocation2]  }
  0x1e   : > { %301 = vadd.xlane.f32.xlu1 %v300_v13  ;;  %s758_s13 = sshll.u32 %s837_s11, 4  ;;  %s759_s13 = int_to_ptr.vmem [resolvable:$false] %s758_s13 }
  0x1f   : > { %675 = vmatmul.mubr.msk.f32.vlgmr.msra.gmra.mrb[0].mxu0 %vm350_vm2, %v287_v7  ;;  %p756_p13 = pnand %p755_p12, %p905_p4  ;;  %s760_s14 = scalar_lea.vmem %s759_s13, 128 }
  0x20   : > { %682 = vmatmul.mubr.msk.f32.vlgmr.msra.gmra.mrb[0].mxu1 %vm350_vm2, %v288_v9  ;;  %294 = vadd.xlane.f32.xlu0 %v293_v14  ;;  %p761_p1 = scmp.lt.s32.totalorder %s952_s6, %s759_s13  ;;  %p762_p2 = scmp.lt.s32.totalorder %s760_s14, %s754_s10 }
  0x21   : > { %p757_p0 = pneg %p756_p13 }
  0x22   : > { %304 = vadd.xlane.f32.xlu1 %v303_v15  ;;  %p763_p3 = por %p762_p2, %p761_p1 }
  0x24   : > { %p764_p5 = pnand %p763_p3, %p757_p0 }
  0xa9   : > { %v292_v16 = vpop.xlane.xlu0 %291 }
  0xaa   : > { %v296_v19 = vmul.f32 0.0625, %v292_v16 }
  0xab   : > { %v302_v17 = vpop.xlane.xlu1 %301 }
  0xac   : > { %v308_v22 = vmul.f32 %v296_v19, %v296_v19  ;;  %v306_v23 = vmul.f32 0.0625, %v302_v17  ;;  %v511_v49 = vmul.f32 %v655_v44, %v296_v19 }
  0xad   : > { %v295_v18 = vpop.xlane.xlu0 %294 }
  0xae   : > { %v297_v20 = vmul.f32 0.0625, %v295_v18  ;;  %v310_v26 = vsub.f32 %v306_v23, %v308_v22 }
  0xaf   : > { %v305_v21 = vpop.xlane.xlu1 %304 }
  0xb0   : > { %v309_v24 = vmul.f32 %v297_v20, %v297_v20  ;;  %v307_v25 = vmul.f32 0.0625, %v305_v21  ;;  %v312_v28 = vmax.f32 %v310_v26, 0.0  ;;  %v512_v53 = vmul.f32 %v656_v45, %v297_v20 }
  0xb2   : > { %v311_v27 = vsub.f32 %v307_v25, %v309_v24  ;;  %v314_v30 = vadd.f32 1e-05, %v312_v28 }
  0xb4   : > { %v313_v29 = vmax.f32 %v311_v27, 0.0  ;;  %750 = vrsqrt.f32 %v314_v30  ;;  %vm318_vm3 = vcmp.eq.f32.partialorder %v314_v30, inf  ;;  %v321_v36 = vand.u32 2147483648, %v314_v30 }
  0xb5   : > { %vm320_vm5 = vcmp.eq.f32.partialorder %v314_v30, 0.0 }
  0xb6   : > { %v315_v31 = vadd.f32 1e-05, %v313_v29 }
  0xb8   : > { %752 = vrsqrt.f32 %v315_v31  ;;  %vm325_vm4 = vcmp.eq.f32.partialorder %v315_v31, inf  ;;  %v328_v38 = vand.u32 2147483648, %v315_v31  ;;  %vm327_vm6 = vcmp.eq.f32.partialorder %v315_v31, 0.0 }
  0xbe   : > { %v751_v32 = vpop.eup %750 }
  0xbf   : > { %v317_v34 = vmul.f32 %v751_v32, %v314_v30 }
  0xc1   : > { %v319_v37 = vsel %vm318_vm3, %v314_v30, %v317_v34 }
  0xc2   : > { %v753_v33 = vpop.eup %752  ;;  %v322_v40 = vsel %vm320_vm5, %v321_v36, %v319_v37 }
  0xc3   : > { %v324_v35 = vmul.f32 %v753_v33, %v315_v31  ;;  %v348_v46 = vmul.f32 %v651_v41, %v322_v40 }
  0xc5   : > { %v326_v39 = vsel %vm325_vm4, %v315_v31, %v324_v35 }
  0xc6   : > { %v329_v42 = vsel %vm327_vm6, %v328_v38, %v326_v39 }
  0xc7   : > { %v349_v48 = vmul.f32 %v652_v43, %v329_v42 }
  0xf2   : > { %v420_v47 = vpop.f32.mrb[0].mxu0 }
  0xf3   : > { %v421_v50 = vadd.f32 %v420_v47, %v348_v46  ;;  %v493_v51 = vpop.f32.mrb[0].mxu1  ;;  %v676_v52 = vpop.f32.mrb[1].mxu0 }
  0xf4   : > { %v494_v54 = vadd.f32 %v493_v51, %v349_v48  ;;  %v683_v55 = vpop.f32.mrb[1].mxu1 }
  0xf5   : > { %v513_v56 = vadd.f32 %v511_v49, %v421_v50 }
  0xf6   : > { %v514_v57 = vadd.f32 %v512_v53, %v494_v54 }
  0xf7   : > { %516 = vst.msk [vmem:[%s259_s5] sm:$0x3] %vm515_vm7, %v513_v56 }
  0xf8   : > { %517 = vst.msk [vmem:[%s259_s5 + $0x2] sm:$0x3] %vm515_vm7, %v514_v57 }
  0xf9   : > { %767 = shalt.err (!%p764_p5)
}
  0xfa   : > { %s768_s12 = scalar_lea.hbm %s950_s9, 64  ;;  %s772_s24 = scalar_lea.hbm %s1006_s4, 128 }
  0xfb   : > { %p769_p6 = scmp.ne.s32.totalorder %s950_s9, %s768_s12  ;;  %p773_p10 = scmp.lt.u32.totalorder %s950_s9, %s1006_s4 }
  0xfc   : > { %p774_p11 = scmp.lt.u32.totalorder %s772_s24, %s768_s12  ;;  %p776_p13 = scmp.lt.u32.totalorder %s768_s12, %s950_s9 }
  0xfd   : > { %p770_p7 = pnand %p769_p6, %p905_p4 }
  0xfe   : > { %p775_p12 = por %p774_p11, %p773_p10 }
  0xff   : > { %p771_p9 = pneg %p770_p7 }
 0x100   : > { %p777_p0 = por %p776_p13, %p775_p12 }
 0x102   : > { %p778_p1 = pnand %p777_p0, %p771_p9 }
 0x104   : > { %781 = shalt.err (!%p778_p1)
}
 0x105   : > { %s838_s5 = smov 32   ;;  %s839_s7 = smov 2  }
 0x106   : > { %690 = dma.vmem_to_hbm [thread:$0]  (%p905_p4), %s952_s6, 64, %s950_s9, %s956_s18, %s838_s5, %s838_s5, %s839_s7  }
 0x107 PF: > { %p696_p2 = scmp.ge.s32.totalorder %s832_s20, 2  ;;  %s548_s29 = sand.u32 1, %s812_s15  }
 0x108   : > { %s549_s8 = scalar_lea.sflag [#allocation3], %s548_s29 }
 0x109   : > { %p693_p3 = pnand %p696_p2, %p912_p8 }
 0x10b   : > { %807 = dma.done.wait (!%p693_p3), %s549_s8, 64  }
 0x10c   : > { %809 = vsyncadd (!%p693_p3), %s549_s8, 4294967232  ;;  %s17_s20 = sadd.s32 1, %s832_s20   ;;  %s1009_s15 = smov %s816_s16 }
 0x10d   : > { %p14_p5 = scmp.ge.s32.totalorder %s17_s20, 4   ;;  %s1010_s16 = smov %s820_s17 }
 0x10e   : > { %s1011_s17 = smov %s918_s28  ;;  %s1012_s18 = smov %s828_s19 }
 0x10f   : > { %s1013_s19 = smov %s1015_s23  ;;  %16 = sbr.rel (!%p14_p5) target bundleno = 4 (0x4), region = 80 }
 0x116   :  { %554 = vsyncpa [#allocation3], 1 }
 0x117   :  { %556 = vsyncpa [#allocation3 + $0x1], 1 }

</bundles_post_ra>
